<compile_context>
chip_gen: v5e
topology: v5e:2x2
jax: 0.10.0
libtpu: 0.0.40
codegen_flags: <defaults>
</compile_context>

<pallas_src>
import functools

import jax
import jax.numpy as jnp
from jax.experimental import pallas as pl
from jax.experimental.pallas import tpu as pltpu  # noqa: F401  (kept for TPU-specific tuning hooks)


def lstm_encoder_kernel(x_ref, wih_ref, whh_ref, b_ref, h0_ref, c0_ref, out_ref,
                        *, seq_len, hidden_size):
    H = hidden_size

    # Hoisted input projection for all timesteps: one (T, I) x (I, 4H) MXU call + bias.
    x_proj = (jnp.dot(x_ref[...], wih_ref[...],
                      preferred_element_type=jnp.float32)
              + b_ref[...])                                   # (T, 4H)

    whh = whh_ref[...]                                        # (H, 4H), read once
    h = h0_ref[...]                                           # (1, H)
    c = c0_ref[...]                                           # (1, H)

    # T is tiny and static -> fully unrolled recurrence, all slices/stores static.
    for t in range(seq_len):
        # Only the recurrent matmul sits on the serial chain.
        gates = x_proj[t:t + 1, :] + jnp.dot(
            h, whh, preferred_element_type=jnp.float32)       # (1, 4H)

        # Two full-vreg EUP pushes per step (sigmoid + tanh), sliced afterwards,
        # instead of four 32-lane pushes.
        sg = jax.nn.sigmoid(gates)
        tg = jnp.tanh(gates)

        i_g = sg[:, 0:H]
        f_g = sg[:, H:2 * H]
        g_g = tg[:, 2 * H:3 * H]
        o_g = sg[:, 3 * H:4 * H]

        c = f_g * c + i_g * g_g
        h = o_g * jnp.tanh(c)

        # Static-index store into the VMEM-resident output block; the single HBM
        # writeback happens once after the kernel (no per-step HBM writes).
        out_ref[t:t + 1, :] = h


def lstm_encoder_forward(x, h0, c0, w_ih, w_hh, b_ih, b_hh):
    """x: (T, I) float32; h0/c0: (1, 1, H); w_ih: (4H, I); w_hh: (4H, H)."""
    T, I = x.shape
    H = h0.shape[-1]

    x2 = x.astype(jnp.float32)                            # (T, I)
    wih_t = jnp.transpose(w_ih).astype(jnp.float32)       # (I, 4H)
    whh_t = jnp.transpose(w_hh).astype(jnp.float32)       # (H, 4H)
    b = (b_ih + b_hh).reshape(1, 4 * H).astype(jnp.float32)
    h0_2 = h0.reshape(1, H).astype(jnp.float32)
    c0_2 = c0.reshape(1, H).astype(jnp.float32)

    kernel = functools.partial(lstm_encoder_kernel, seq_len=T, hidden_size=H)

    # Single invocation, no grid: every operand is a full-array VMEM block.
    out = pl.pallas_call(
        kernel,
        out_shape=jax.ShapeDtypeStruct((T, H), jnp.float32),
    )(x2, wih_t, whh_t, b, h0_2, c0_2)

    # output[-1].reshape(-1, hidden_size)  ->  (T, H)
    return out


def lstm_reference(x, h0, c0, w_ih, w_hh, b_ih, b_hh):
    """Pure-JAX reference matching torch.nn.LSTM semantics."""
    H = h0.shape[-1]
    b = b_ih + b_hh

    def step(carry, x_t):
        h, c = carry
        gates = x_t @ w_ih.T + h @ w_hh.T + b
        i_g = jax.nn.sigmoid(gates[0:H])
        f_g = jax.nn.sigmoid(gates[H:2 * H])
        g_g = jnp.tanh(gates[2 * H:3 * H])
        o_g = jax.nn.sigmoid(gates[3 * H:4 * H])
        c_new = f_g * c + i_g * g_g
        h_new = o_g * jnp.tanh(c_new)
        return (h_new, c_new), h_new

    (_, _), hs = jax.lax.scan(step, (h0.reshape(H), c0.reshape(H)), x)
    return hs  # (T, H)


if __name__ == "__main__":
    input_size = 16
    hidden_size = 32
    seq_len = 8

    key = jax.random.PRNGKey(0)
    kx, kh, kc, k1, k2, k3, k4 = jax.random.split(key, 7)

    # Deterministic parameter init (PyTorch LSTM default: U(-1/sqrt(H), 1/sqrt(H))).
    bound = 1.0 / (hidden_size ** 0.5)
    w_ih = jax.random.uniform(k1, (4 * hidden_size, input_size),
                              minval=-bound, maxval=bound, dtype=jnp.float32)
    w_hh = jax.random.uniform(k2, (4 * hidden_size, hidden_size),
                              minval=-bound, maxval=bound, dtype=jnp.float32)
    b_ih = jax.random.uniform(k3, (4 * hidden_size,),
                              minval=-bound, maxval=bound, dtype=jnp.float32)
    b_hh = jax.random.uniform(k4, (4 * hidden_size,),
                              minval=-bound, maxval=bound, dtype=jnp.float32)

    # Example inputs: flat input that the module views as (1, T, input_size),
    # and a non-trivial hidden state (init_hidden() would give zeros).
    x = jax.random.normal(kx, (seq_len, input_size), dtype=jnp.float32)
    h0 = jax.random.normal(kh, (1, 1, hidden_size), dtype=jnp.float32) * 0.1
    c0 = jax.random.normal(kc, (1, 1, hidden_size), dtype=jnp.float32) * 0.1

    out = lstm_encoder_forward(x, h0, c0, w_ih, w_hh, b_ih, b_hh)
    out = jax.block_until_ready(out)

    ref = lstm_reference(x, h0, c0, w_ih, w_hh, b_ih, b_hh)
    assert out.shape == (seq_len, hidden_size)
    assert jnp.allclose(out, ref, atol=1e-4, rtol=1e-4), "mismatch vs reference"

    print("KERNEL_OK")
</pallas_src>

<mosaic_0001>
module attributes {stable_mosaic.version = 11 : i64} {
  func.func @lstm_encoder_kernel(%arg0: memref<8x16xf32, #tpu.memory_space<vmem>>, %arg1: memref<16x128xf32, #tpu.memory_space<vmem>>, %arg2: memref<32x128xf32, #tpu.memory_space<vmem>>, %arg3: memref<1x128xf32, #tpu.memory_space<vmem>>, %arg4: memref<1x32xf32, #tpu.memory_space<vmem>>, %arg5: memref<1x32xf32, #tpu.memory_space<vmem>>, %arg6: memref<8x32xf32, #tpu.memory_space<vmem>>) attributes {dimension_semantics = [], scalar_prefetch = 0 : i64, scratch_operands = 0 : i64, tpu.core_type = #tpu.core_type<tc>} {
    %c0 = arith.constant 0 : index
    %c0_0 = arith.constant 0 : index
    %0 = vector.load %arg0[%c0, %c0_0] : memref<8x16xf32, #tpu.memory_space<vmem>>, vector<8x16xf32>
    %c0_1 = arith.constant 0 : index
    %c0_2 = arith.constant 0 : index
    %1 = vector.load %arg1[%c0_1, %c0_2] : memref<16x128xf32, #tpu.memory_space<vmem>>, vector<16x128xf32>
    %cst = arith.constant dense<0.000000e+00> : vector<8x128xf32>
    %2 = tpu.matmul %0, %1, %cst {dimension_numbers = #tpu.dot_dimension_numbers<[1], [0], [0], [1], [0, 0, 1, 1], [], []>} : vector<8x16xf32>, vector<16x128xf32>, vector<8x128xf32> -> vector<8x128xf32>
    %c0_3 = arith.constant 0 : index
    %c0_4 = arith.constant 0 : index
    %3 = vector.load %arg3[%c0_3, %c0_4] : memref<1x128xf32, #tpu.memory_space<vmem>>, vector<1x128xf32>
    %4 = vector.broadcast %3 : vector<1x128xf32> to vector<8x128xf32>
    %5 = arith.addf %2, %4 : vector<8x128xf32>
    %c0_5 = arith.constant 0 : index
    %c0_6 = arith.constant 0 : index
    %6 = vector.load %arg2[%c0_5, %c0_6] : memref<32x128xf32, #tpu.memory_space<vmem>>, vector<32x128xf32>
    %c0_7 = arith.constant 0 : index
    %c0_8 = arith.constant 0 : index
    %7 = vector.load %arg4[%c0_7, %c0_8] : memref<1x32xf32, #tpu.memory_space<vmem>>, vector<1x32xf32>
    %c0_9 = arith.constant 0 : index
    %c0_10 = arith.constant 0 : index
    %8 = vector.load %arg5[%c0_9, %c0_10] : memref<1x32xf32, #tpu.memory_space<vmem>>, vector<1x32xf32>
    %9 = vector.extract_strided_slice %5 {offsets = [0, 0], sizes = [1, 128], strides = [1, 1]} : vector<8x128xf32> to vector<1x128xf32>
    %cst_11 = arith.constant dense<0.000000e+00> : vector<1x128xf32>
    %10 = tpu.matmul %7, %6, %cst_11 {dimension_numbers = #tpu.dot_dimension_numbers<[1], [0], [0], [1], [0, 0, 1, 1], [], []>} : vector<1x32xf32>, vector<32x128xf32>, vector<1x128xf32> -> vector<1x128xf32>
    %11 = arith.addf %9, %10 : vector<1x128xf32>
    %12 = arith.negf %11 : vector<1x128xf32>
    %13 = math.exp %12 : vector<1x128xf32>
    %cst_12 = arith.constant 1.000000e+00 : f32
    %14 = vector.broadcast %cst_12 : f32 to vector<1x128xf32>
    %15 = arith.addf %14, %13 : vector<1x128xf32>
    %16 = arith.divf %14, %15 : vector<1x128xf32>
    %17 = math.tanh %11 : vector<1x128xf32>
    %18 = vector.extract_strided_slice %16 {offsets = [0, 0], sizes = [1, 32], strides = [1, 1]} : vector<1x128xf32> to vector<1x32xf32>
    %19 = vector.extract_strided_slice %16 {offsets = [0, 32], sizes = [1, 32], strides = [1, 1]} : vector<1x128xf32> to vector<1x32xf32>
    %20 = vector.extract_strided_slice %17 {offsets = [0, 64], sizes = [1, 32], strides = [1, 1]} : vector<1x128xf32> to vector<1x32xf32>
    %21 = vector.extract_strided_slice %16 {offsets = [0, 96], sizes = [1, 32], strides = [1, 1]} : vector<1x128xf32> to vector<1x32xf32>
    %22 = arith.mulf %19, %8 : vector<1x32xf32>
    %23 = arith.mulf %18, %20 : vector<1x32xf32>
    %24 = arith.addf %22, %23 : vector<1x32xf32>
    %25 = math.tanh %24 : vector<1x32xf32>
    %26 = arith.mulf %21, %25 : vector<1x32xf32>
    %c0_13 = arith.constant 0 : index
    %c0_14 = arith.constant 0 : index
    %27 = vector.load %arg6[%c0_13, %c0_14] : memref<8x32xf32, #tpu.memory_space<vmem>>, vector<1x32xf32>
    tpu.vector_store %arg6[%c0_13, %c0_14], %26 {strides = array<i32>} : memref<8x32xf32, #tpu.memory_space<vmem>>, vector<1x32xf32>,
    %28 = vector.extract_strided_slice %5 {offsets = [1, 0], sizes = [1, 128], strides = [1, 1]} : vector<8x128xf32> to vector<1x128xf32>
    %cst_15 = arith.constant dense<0.000000e+00> : vector<1x128xf32>
    %29 = tpu.matmul %26, %6, %cst_15 {dimension_numbers = #tpu.dot_dimension_numbers<[1], [0], [0], [1], [0, 0, 1, 1], [], []>} : vector<1x32xf32>, vector<32x128xf32>, vector<1x128xf32> -> vector<1x128xf32>
    %30 = arith.addf %28, %29 : vector<1x128xf32>
    %31 = arith.negf %30 : vector<1x128xf32>
    %32 = math.exp %31 : vector<1x128xf32>
    %cst_16 = arith.constant 1.000000e+00 : f32
    %33 = vector.broadcast %cst_16 : f32 to vector<1x128xf32>
    %34 = arith.addf %33, %32 : vector<1x128xf32>
    %35 = arith.divf %33, %34 : vector<1x128xf32>
    %36 = math.tanh %30 : vector<1x128xf32>
    %37 = vector.extract_strided_slice %35 {offsets = [0, 0], sizes = [1, 32], strides = [1, 1]} : vector<1x128xf32> to vector<1x32xf32>
    %38 = vector.extract_strided_slice %35 {offsets = [0, 32], sizes = [1, 32], strides = [1, 1]} : vector<1x128xf32> to vector<1x32xf32>
    %39 = vector.extract_strided_slice %36 {offsets = [0, 64], sizes = [1, 32], strides = [1, 1]} : vector<1x128xf32> to vector<1x32xf32>
    %40 = vector.extract_strided_slice %35 {offsets = [0, 96], sizes = [1, 32], strides = [1, 1]} : vector<1x128xf32> to vector<1x32xf32>
    %41 = arith.mulf %38, %24 : vector<1x32xf32>
    %42 = arith.mulf %37, %39 : vector<1x32xf32>
    %43 = arith.addf %41, %42 : vector<1x32xf32>
    %44 = math.tanh %43 : vector<1x32xf32>
    %45 = arith.mulf %40, %44 : vector<1x32xf32>
    %c1 = arith.constant 1 : index
    %c0_17 = arith.constant 0 : index
    %46 = vector.load %arg6[%c1, %c0_17] : memref<8x32xf32, #tpu.memory_space<vmem>>, vector<1x32xf32>
    tpu.vector_store %arg6[%c1, %c0_17], %45 {strides = array<i32>} : memref<8x32xf32, #tpu.memory_space<vmem>>, vector<1x32xf32>,
    %47 = vector.extract_strided_slice %5 {offsets = [2, 0], sizes = [1, 128], strides = [1, 1]} : vector<8x128xf32> to vector<1x128xf32>
    %cst_18 = arith.constant dense<0.000000e+00> : vector<1x128xf32>
    %48 = tpu.matmul %45, %6, %cst_18 {dimension_numbers = #tpu.dot_dimension_numbers<[1], [0], [0], [1], [0, 0, 1, 1], [], []>} : vector<1x32xf32>, vector<32x128xf32>, vector<1x128xf32> -> vector<1x128xf32>
    %49 = arith.addf %47, %48 : vector<1x128xf32>
    %50 = arith.negf %49 : vector<1x128xf32>
    %51 = math.exp %50 : vector<1x128xf32>
    %cst_19 = arith.constant 1.000000e+00 : f32
    %52 = vector.broadcast %cst_19 : f32 to vector<1x128xf32>
    %53 = arith.addf %52, %51 : vector<1x128xf32>
    %54 = arith.divf %52, %53 : vector<1x128xf32>
    %55 = math.tanh %49 : vector<1x128xf32>
    %56 = vector.extract_strided_slice %54 {offsets = [0, 0], sizes = [1, 32], strides = [1, 1]} : vector<1x128xf32> to vector<1x32xf32>
    %57 = vector.extract_strided_slice %54 {offsets = [0, 32], sizes = [1, 32], strides = [1, 1]} : vector<1x128xf32> to vector<1x32xf32>
    %58 = vector.extract_strided_slice %55 {offsets = [0, 64], sizes = [1, 32], strides = [1, 1]} : vector<1x128xf32> to vector<1x32xf32>
    %59 = vector.extract_strided_slice %54 {offsets = [0, 96], sizes = [1, 32], strides = [1, 1]} : vector<1x128xf32> to vector<1x32xf32>
    %60 = arith.mulf %57, %43 : vector<1x32xf32>
    %61 = arith.mulf %56, %58 : vector<1x32xf32>
    %62 = arith.addf %60, %61 : vector<1x32xf32>
    %63 = math.tanh %62 : vector<1x32xf32>
    %64 = arith.mulf %59, %63 : vector<1x32xf32>
    %c2 = arith.constant 2 : index
    %c0_20 = arith.constant 0 : index
    %65 = vector.load %arg6[%c2, %c0_20] : memref<8x32xf32, #tpu.memory_space<vmem>>, vector<1x32xf32>
    tpu.vector_store %arg6[%c2, %c0_20], %64 {strides = array<i32>} : memref<8x32xf32, #tpu.memory_space<vmem>>, vector<1x32xf32>,
    %66 = vector.extract_strided_slice %5 {offsets = [3, 0], sizes = [1, 128], strides = [1, 1]} : vector<8x128xf32> to vector<1x128xf32>
    %cst_21 = arith.constant dense<0.000000e+00> : vector<1x128xf32>
    %67 = tpu.matmul %64, %6, %cst_21 {dimension_numbers = #tpu.dot_dimension_numbers<[1], [0], [0], [1], [0, 0, 1, 1], [], []>} : vector<1x32xf32>, vector<32x128xf32>, vector<1x128xf32> -> vector<1x128xf32>
    %68 = arith.addf %66, %67 : vector<1x128xf32>
    %69 = arith.negf %68 : vector<1x128xf32>
    %70 = math.exp %69 : vector<1x128xf32>
    %cst_22 = arith.constant 1.000000e+00 : f32
    %71 = vector.broadcast %cst_22 : f32 to vector<1x128xf32>
    %72 = arith.addf %71, %70 : vector<1x128xf32>
    %73 = arith.divf %71, %72 : vector<1x128xf32>
    %74 = math.tanh %68 : vector<1x128xf32>
    %75 = vector.extract_strided_slice %73 {offsets = [0, 0], sizes = [1, 32], strides = [1, 1]} : vector<1x128xf32> to vector<1x32xf32>
    %76 = vector.extract_strided_slice %73 {offsets = [0, 32], sizes = [1, 32], strides = [1, 1]} : vector<1x128xf32> to vector<1x32xf32>
    %77 = vector.extract_strided_slice %74 {offsets = [0, 64], sizes = [1, 32], strides = [1, 1]} : vector<1x128xf32> to vector<1x32xf32>
    %78 = vector.extract_strided_slice %73 {offsets = [0, 96], sizes = [1, 32], strides = [1, 1]} : vector<1x128xf32> to vector<1x32xf32>
    %79 = arith.mulf %76, %62 : vector<1x32xf32>
    %80 = arith.mulf %75, %77 : vector<1x32xf32>
    %81 = arith.addf %79, %80 : vector<1x32xf32>
    %82 = math.tanh %81 : vector<1x32xf32>
    %83 = arith.mulf %78, %82 : vector<1x32xf32>
    %c3 = arith.constant 3 : index
    %c0_23 = arith.constant 0 : index
    %84 = vector.load %arg6[%c3, %c0_23] : memref<8x32xf32, #tpu.memory_space<vmem>>, vector<1x32xf32>
    tpu.vector_store %arg6[%c3, %c0_23], %83 {strides = array<i32>} : memref<8x32xf32, #tpu.memory_space<vmem>>, vector<1x32xf32>,
    %85 = vector.extract_strided_slice %5 {offsets = [4, 0], sizes = [1, 128], strides = [1, 1]} : vector<8x128xf32> to vector<1x128xf32>
    %cst_24 = arith.constant dense<0.000000e+00> : vector<1x128xf32>
    %86 = tpu.matmul %83, %6, %cst_24 {dimension_numbers = #tpu.dot_dimension_numbers<[1], [0], [0], [1], [0, 0, 1, 1], [], []>} : vector<1x32xf32>, vector<32x128xf32>, vector<1x128xf32> -> vector<1x128xf32>
    %87 = arith.addf %85, %86 : vector<1x128xf32>
    %88 = arith.negf %87 : vector<1x128xf32>
    %89 = math.exp %88 : vector<1x128xf32>
    %cst_25 = arith.constant 1.000000e+00 : f32
    %90 = vector.broadcast %cst_25 : f32 to vector<1x128xf32>
    %91 = arith.addf %90, %89 : vector<1x128xf32>
    %92 = arith.divf %90, %91 : vector<1x128xf32>
    %93 = math.tanh %87 : vector<1x128xf32>
    %94 = vector.extract_strided_slice %92 {offsets = [0, 0], sizes = [1, 32], strides = [1, 1]} : vector<1x128xf32> to vector<1x32xf32>
    %95 = vector.extract_strided_slice %92 {offsets = [0, 32], sizes = [1, 32], strides = [1, 1]} : vector<1x128xf32> to vector<1x32xf32>
    %96 = vector.extract_strided_slice %93 {offsets = [0, 64], sizes = [1, 32], strides = [1, 1]} : vector<1x128xf32> to vector<1x32xf32>
    %97 = vector.extract_strided_slice %92 {offsets = [0, 96], sizes = [1, 32], strides = [1, 1]} : vector<1x128xf32> to vector<1x32xf32>
    %98 = arith.mulf %95, %81 : vector<1x32xf32>
    %99 = arith.mulf %94, %96 : vector<1x32xf32>
    %100 = arith.addf %98, %99 : vector<1x32xf32>
    %101 = math.tanh %100 : vector<1x32xf32>
    %102 = arith.mulf %97, %101 : vector<1x32xf32>
    %c4 = arith.constant 4 : index
    %c0_26 = arith.constant 0 : index
    %103 = vector.load %arg6[%c4, %c0_26] : memref<8x32xf32, #tpu.memory_space<vmem>>, vector<1x32xf32>
    tpu.vector_store %arg6[%c4, %c0_26], %102 {strides = array<i32>} : memref<8x32xf32, #tpu.memory_space<vmem>>, vector<1x32xf32>,
    %104 = vector.extract_strided_slice %5 {offsets = [5, 0], sizes = [1, 128], strides = [1, 1]} : vector<8x128xf32> to vector<1x128xf32>
    %cst_27 = arith.constant dense<0.000000e+00> : vector<1x128xf32>
    %105 = tpu.matmul %102, %6, %cst_27 {dimension_numbers = #tpu.dot_dimension_numbers<[1], [0], [0], [1], [0, 0, 1, 1], [], []>} : vector<1x32xf32>, vector<32x128xf32>, vector<1x128xf32> -> vector<1x128xf32>
    %106 = arith.addf %104, %105 : vector<1x128xf32>
    %107 = arith.negf %106 : vector<1x128xf32>
    %108 = math.exp %107 : vector<1x128xf32>
    %cst_28 = arith.constant 1.000000e+00 : f32
    %109 = vector.broadcast %cst_28 : f32 to vector<1x128xf32>
    %110 = arith.addf %109, %108 : vector<1x128xf32>
    %111 = arith.divf %109, %110 : vector<1x128xf32>
    %112 = math.tanh %106 : vector<1x128xf32>
    %113 = vector.extract_strided_slice %111 {offsets = [0, 0], sizes = [1, 32], strides = [1, 1]} : vector<1x128xf32> to vector<1x32xf32>
    %114 = vector.extract_strided_slice %111 {offsets = [0, 32], sizes = [1, 32], strides = [1, 1]} : vector<1x128xf32> to vector<1x32xf32>
    %115 = vector.extract_strided_slice %112 {offsets = [0, 64], sizes = [1, 32], strides = [1, 1]} : vector<1x128xf32> to vector<1x32xf32>
    %116 = vector.extract_strided_slice %111 {offsets = [0, 96], sizes = [1, 32], strides = [1, 1]} : vector<1x128xf32> to vector<1x32xf32>
    %117 = arith.mulf %114, %100 : vector<1x32xf32>
    %118 = arith.mulf %113, %115 : vector<1x32xf32>
    %119 = arith.addf %117, %118 : vector<1x32xf32>
    %120 = math.tanh %119 : vector<1x32xf32>
    %121 = arith.mulf %116, %120 : vector<1x32xf32>
    %c5 = arith.constant 5 : index
    %c0_29 = arith.constant 0 : index
    %122 = vector.load %arg6[%c5, %c0_29] : memref<8x32xf32, #tpu.memory_space<vmem>>, vector<1x32xf32>
    tpu.vector_store %arg6[%c5, %c0_29], %121 {strides = array<i32>} : memref<8x32xf32, #tpu.memory_space<vmem>>, vector<1x32xf32>,
    %123 = vector.extract_strided_slice %5 {offsets = [6, 0], sizes = [1, 128], strides = [1, 1]} : vector<8x128xf32> to vector<1x128xf32>
    %cst_30 = arith.constant dense<0.000000e+00> : vector<1x128xf32>
    %124 = tpu.matmul %121, %6, %cst_30 {dimension_numbers = #tpu.dot_dimension_numbers<[1], [0], [0], [1], [0, 0, 1, 1], [], []>} : vector<1x32xf32>, vector<32x128xf32>, vector<1x128xf32> -> vector<1x128xf32>
    %125 = arith.addf %123, %124 : vector<1x128xf32>
    %126 = arith.negf %125 : vector<1x128xf32>
    %127 = math.exp %126 : vector<1x128xf32>
    %cst_31 = arith.constant 1.000000e+00 : f32
    %128 = vector.broadcast %cst_31 : f32 to vector<1x128xf32>
    %129 = arith.addf %128, %127 : vector<1x128xf32>
    %130 = arith.divf %128, %129 : vector<1x128xf32>
    %131 = math.tanh %125 : vector<1x128xf32>
    %132 = vector.extract_strided_slice %130 {offsets = [0, 0], sizes = [1, 32], strides = [1, 1]} : vector<1x128xf32> to vector<1x32xf32>
    %133 = vector.extract_strided_slice %130 {offsets = [0, 32], sizes = [1, 32], strides = [1, 1]} : vector<1x128xf32> to vector<1x32xf32>
    %134 = vector.extract_strided_slice %131 {offsets = [0, 64], sizes = [1, 32], strides = [1, 1]} : vector<1x128xf32> to vector<1x32xf32>
    %135 = vector.extract_strided_slice %130 {offsets = [0, 96], sizes = [1, 32], strides = [1, 1]} : vector<1x128xf32> to vector<1x32xf32>
    %136 = arith.mulf %133, %119 : vector<1x32xf32>
    %137 = arith.mulf %132, %134 : vector<1x32xf32>
    %138 = arith.addf %136, %137 : vector<1x32xf32>
    %139 = math.tanh %138 : vector<1x32xf32>
    %140 = arith.mulf %135, %139 : vector<1x32xf32>
    %c6 = arith.constant 6 : index
    %c0_32 = arith.constant 0 : index
    %141 = vector.load %arg6[%c6, %c0_32] : memref<8x32xf32, #tpu.memory_space<vmem>>, vector<1x32xf32>
    tpu.vector_store %arg6[%c6, %c0_32], %140 {strides = array<i32>} : memref<8x32xf32, #tpu.memory_space<vmem>>, vector<1x32xf32>,
    %142 = vector.extract_strided_slice %5 {offsets = [7, 0], sizes = [1, 128], strides = [1, 1]} : vector<8x128xf32> to vector<1x128xf32>
    %cst_33 = arith.constant dense<0.000000e+00> : vector<1x128xf32>
    %143 = tpu.matmul %140, %6, %cst_33 {dimension_numbers = #tpu.dot_dimension_numbers<[1], [0], [0], [1], [0, 0, 1, 1], [], []>} : vector<1x32xf32>, vector<32x128xf32>, vector<1x128xf32> -> vector<1x128xf32>
    %144 = arith.addf %142, %143 : vector<1x128xf32>
    %145 = arith.negf %144 : vector<1x128xf32>
    %146 = math.exp %145 : vector<1x128xf32>
    %cst_34 = arith.constant 1.000000e+00 : f32
    %147 = vector.broadcast %cst_34 : f32 to vector<1x128xf32>
    %148 = arith.addf %147, %146 : vector<1x128xf32>
    %149 = arith.divf %147, %148 : vector<1x128xf32>
    %150 = math.tanh %144 : vector<1x128xf32>
    %151 = vector.extract_strided_slice %149 {offsets = [0, 0], sizes = [1, 32], strides = [1, 1]} : vector<1x128xf32> to vector<1x32xf32>
    %152 = vector.extract_strided_slice %149 {offsets = [0, 32], sizes = [1, 32], strides = [1, 1]} : vector<1x128xf32> to vector<1x32xf32>
    %153 = vector.extract_strided_slice %150 {offsets = [0, 64], sizes = [1, 32], strides = [1, 1]} : vector<1x128xf32> to vector<1x32xf32>
    %154 = vector.extract_strided_slice %149 {offsets = [0, 96], sizes = [1, 32], strides = [1, 1]} : vector<1x128xf32> to vector<1x32xf32>
    %155 = arith.mulf %152, %138 : vector<1x32xf32>
    %156 = arith.mulf %151, %153 : vector<1x32xf32>
    %157 = arith.addf %155, %156 : vector<1x32xf32>
    %158 = math.tanh %157 : vector<1x32xf32>
    %159 = arith.mulf %154, %158 : vector<1x32xf32>
    %c7 = arith.constant 7 : index
    %c0_35 = arith.constant 0 : index
    %160 = vector.load %arg6[%c7, %c0_35] : memref<8x32xf32, #tpu.memory_space<vmem>>, vector<1x32xf32>
    tpu.vector_store %arg6[%c7, %c0_35], %159 {strides = array<i32>} : memref<8x32xf32, #tpu.memory_space<vmem>>, vector<1x32xf32>,
    return
  }
}

</mosaic_0001>

<bundles_post_ra>
// kernel: tpu_custom_call.1
= control target key start
LH: loop header
LB: loop body
LE: loop exit
PB: predicated region body
PF: predicated region fallthrough
CT: control target
= control target key end

     0   :  { %11 = vsyncpa [#allocation3], 0  ;;  %s1053_s0 = inlined_call_operand.hbm [shape: f32[8,16], index: 0, kind: input, shape index: {}]   ;;  %s1054_s1 = inlined_call_operand.hbm [shape: f32[16,128], index: 1, kind: input, shape index: {}]   ;;  %s1055_s2 = inlined_call_operand.hbm [shape: f32[32,128], index: 2, kind: input, shape index: {}]   ;;  %s1056_s3 = inlined_call_operand.vmem [shape: f32[1,128], index: 3, kind: input, shape index: {}]   ;;  %s1057_s4 = inlined_call_operand.vmem [shape: f32[1,32], index: 4, kind: input, shape index: {}]   ;;  %s1058_s5 = inlined_call_operand.vmem [shape: f32[1,32], index: 5, kind: input, shape index: {}]   ;;  %s1059_s6 = inlined_call_operand.hbm [shape: f32[8,32], index: 6, kind: output, shape index: {}]  }
   0x1   :  { %12 = vsyncpa [#allocation6], 0  ;;  %s29_s23 = sshll.u32 %s1054_s1, 4  ;;  %s30_s23 = int_to_ptr.hbm [resolvable:$true] %s29_s23 }
   0x2   :  { %13 = vsyncpa [#allocation4], 0  ;;  %s912_s24 = smov [#allocation5]   ;;  %s19_s28 = sshll.u32 %s1053_s0, 4  ;;  %s20_s28 = int_to_ptr.hbm [resolvable:$true] %s19_s28 }
   0x3   :  { %s31_s25 = sshll.u32 %s912_s24, 4  ;;  %s913_s29 = smov 128   ;;  %s32_s25 = int_to_ptr.vmem [resolvable:$true] %s31_s25 }
   0x4   :  { %s914_s30 = smov 8   ;;  %s915_s7 = smov [#allocation2]  }
   0x5   :  { %37 = dma.hbm_to_vmem [thread:$0]  %s30_s23, 256, %s32_s25, [#allocation6], %s913_s29, %s913_s29, %s914_s30  }
   0x6   :  { %s21_s8 = sshll.u32 %s915_s7, 4  ;;  %s42_s11 = sshll.u32 %s1055_s2, 4  ;;  %s22_s8 = int_to_ptr.vmem [resolvable:$true] %s21_s8  ;;  %s43_s11 = int_to_ptr.hbm [resolvable:$true] %s42_s11 }
   0x7   :  { %24 = dma.hbm_to_vmem [thread:$0]  %s20_s28, 128, %s22_s8, [#allocation3]  }
   0x8   :  { %s916_s1 = smov [#allocation7]  }
   0x9   :  { %s44_s12 = sshll.u32 %s916_s1, 4  ;;  %s45_s12 = int_to_ptr.vmem [resolvable:$true] %s44_s12 }
   0xa   :  { %50 = dma.hbm_to_vmem [thread:$0]  %s43_s11, 512, %s45_s12, [#allocation6], %s913_s29, %s913_s29, %s914_s30  }
   0xb   :  { %906 = dma.done.wait [#allocation3], 128  }
   0xc   :  { %907 = vsyncadd [#allocation3], 4294967168 }
   0xd   :  { %908 = dma.done.wait [#allocation6], 768  }
   0xe   :  { %909 = vsyncadd [#allocation6], 4294966528  ;;  %v103_v0 = vld [vmem:[#allocation7 + $0x18] sm:$0xff]  ;;  %v102_v2 = vld [vmem:[#allocation7 + $0x10] sm:$0xff]  ;;  %vm76_vm0 = vcmask 130048   ;;  %vm106_vm1 = vcmask 261120  }
   0xf   :  { %v71_v1 = vld [vmem:[#allocation5 + $0x8] sm:$0xff]  ;;  %122 = vmatpush.msra.mxu1 %v103_v0  ;;  %v70_v3 = vld [vmem:[#allocation5] sm:$0xff]  ;;  %v69_v4 = vld [vmem:[#allocation2] sm:$0xff]  ;;  %193 = vmatpush.msra.mxu2 %v103_v0  ;;  %s917_s14 = smov 64   ;;  %s918_s17 = smov 32   ;;  %vm177_vm6 = vcmask 253952  }
  0x10   :  { %94 = vmatpush.msra.mxu0 %v71_v1  ;;  %v101_v5 = vld [vmem:[#allocation7 + $0x8] sm:$0xff]  ;;  %268 = vmatpush.msra.mxu3 %v103_v0  ;;  %v100_v6 = vld [vmem:[#allocation7] sm:$0xff]  ;;  %s708_s20 = sshll.u32 %s1059_s6, 4  ;;  %s709_s20 = int_to_ptr.hbm [resolvable:$true] %s708_s20 }
  0x11   :  { %123 = vmatpush.msra.mxu1 %v102_v2  ;;  %194 = vmatpush.msra.mxu2 %v102_v2  ;;  %v104_v7 = vld [vmem:[%s1057_s4] sm:$0x1] }
  0x12   :  { %95 = vmatpush.msra.mxu0 %v70_v3  ;;  %269 = vmatpush.msra.mxu3 %v102_v2  ;;  %v744_v8 = vld [vmem:[%s1056_s3] ss:$0 sm:$0xff]  ;;  %s919_s3 = smov [#allocation8]  }
  0x13   :  { %719 = vmatmul.msk.f32.vlgmr.msra.gmra.mxu0 %vm76_vm0, %v69_v4  ;;  %124 = vmatpush.msra.mxu1 %v101_v5  ;;  %v745_v14 = vld [vmem:[%s1058_s5] ss:$0 sm:$0xff]  ;;  %s706_s5 = sshll.u32 %s919_s3, 4  ;;  %s707_s5 = int_to_ptr.vmem [resolvable:$true] %s706_s5 }
  0x14   :  { %195 = vmatpush.msra.mxu2 %v101_v5  ;;  %343 = vmatpush.msrb.mxu0 %v103_v0 }
  0x15   :  { %125 = vmatpush.msra.mxu1 %v100_v6  ;;  %270 = vmatpush.msra.mxu3 %v101_v5 }
  0x16   :  { %720 = vmatmul.msk.f32.vlgmr.msra.gmra.mxu1 %vm106_vm1, %v104_v7  ;;  %196 = vmatpush.msra.mxu2 %v100_v6 }
  0x17   :  { %271 = vmatpush.msra.mxu3 %v100_v6  ;;  %344 = vmatpush.msrb.mxu0 %v102_v2 }
  0x18   :  { %418 = vmatpush.msrb.mxu1 %v103_v0  ;;  %493 = vmatpush.msrb.mxu2 %v103_v0 }
  0x19   :  { %345 = vmatpush.msrb.mxu0 %v101_v5  ;;  %568 = vmatpush.msrb.mxu3 %v103_v0 }
  0x1a   :  { %419 = vmatpush.msrb.mxu1 %v102_v2  ;;  %494 = vmatpush.msrb.mxu2 %v102_v2 }
  0x1b   :  { %346 = vmatpush.msrb.mxu0 %v100_v6  ;;  %569 = vmatpush.msrb.mxu3 %v102_v2 }
  0x1c   :  { %420 = vmatpush.msrb.mxu1 %v101_v5  ;;  %495 = vmatpush.msrb.mxu2 %v101_v5 }
  0x1d   :  { %570 = vmatpush.msrb.mxu3 %v101_v5  ;;  %643 = vmatpush.msra.mxu0 %v103_v0 }
  0x1e   :  { %421 = vmatpush.msrb.mxu1 %v100_v6  ;;  %496 = vmatpush.msrb.mxu2 %v100_v6 }
  0x1f   :  { %571 = vmatpush.msrb.mxu3 %v100_v6  ;;  %644 = vmatpush.msra.mxu0 %v102_v2 }
  0x21   :  { %645 = vmatpush.msra.mxu0 %v101_v5 }
  0x23   :  { %646 = vmatpush.msra.mxu0 %v100_v6 }
  0x90   :  { %v97_v9 = vpop.f32.mrf.mxu0 }
  0x91   :  { %v971_v10 = vadd.f32 %v744_v8, %v97_v9 }
  0x93   :  { %v127_v11 = vpop.f32.mrf.mxu1 }
  0x94   :  { %v130_v12 = vadd.f32 %v127_v11, %v971_v10 }
  0x96   :  { %746 = vtanh.f32 %v130_v12  ;;  %v721_v15 = vmul.f32 -1.442695, %v130_v12 }
  0x98   :  { %748 = vpow2.f32 %v721_v15 }
  0x9c   :  { %v747_v13 = vpop.eup %746 }
  0x9d   :  { %158 = vrot.lane.b32.xlu0 %v747_v13, %s917_s14 }
  0x9e   :  { %v749_v16 = vpop.eup %748 }
  0x9f   :  { %v134_v17 = vadd.f32 1.0, %v749_v16 }
  0xa1   :  { %750 = vrcp.f32 %v134_v17  ;;  %v146_v23 = vand.u32 2147483648, %v134_v17  ;;  %vm140_vm3 = vweird.f32 %v134_v17  ;;  %v144_v24 = vand.u32 2147483647, %v134_v17 }
  0xa3   :  { %v147_v26 = vor.u32 1.1754944e-38, %v146_v23  ;;  %vm145_vm5 = vcmp.eq.f32.partialorder %v144_v24, 8.507059e+37 }
  0xa5   :  { %153 = vrot.lane.b32.xlu0 %v745_v14, %s918_s17 }
  0xa7   :  { %v751_v18 = vpop.eup %750 }
  0xa8   :  { %v136_v19 = vmul.f32 %v751_v18, %v134_v17  ;;  %vm141_vm2 = vweird.f32 %v751_v18 }
  0xa9   :  { %vm142_vm4 = vmor %vm140_vm3, %vm141_vm2 }
  0xaa   :  { %v137_v20 = vsub.f32 1.0, %v136_v19 }
  0xac   :  { %v138_v21 = vmul.f32 %v751_v18, %v137_v20 }
  0xae   :  { %v139_v22 = vadd.f32 %v751_v18, %v138_v21 }
  0xb0   :  { %v143_v25 = vsel %vm142_vm4, %v751_v18, %v139_v22 }
  0xb1   :  { %v148_v28 = vsel %vm145_vm5, %v147_v26, %v143_v25 }
 0x10f   :  { %v159_v27 = vpop.permute.xlu0 %158 }
 0x110   :  { %v161_v29 = vmul.f32 %v159_v27, %v148_v28 }
 0x112   :  { %163 = vrot.lane.b32.xlu1 %v161_v29, %s918_s17 }
 0x117   :  { %v154_v30 = vpop.permute.xlu0 %153 }
 0x118   :  { %v156_v31 = vmul.f32 %v154_v30, %v148_v28 }
 0x184   :  { %v164_v32 = vpop.permute.xlu1 %163 }
 0x185   :  { %v166_v33 = vadd.f32 %v164_v32, %v156_v31 }
 0x187   :  { %752 = vtanh.f32 %v166_v33  ;;  %v226_v57 = vrot.slane %v166_v33, 7 }
 0x18d   :  { %v753_v34 = vpop.eup %752 }
 0x18e   :  { %169 = vrot.lane.b32.xlu1 %v753_v34, %s917_s14 }
 0x200   :  { %v170_v35 = vpop.permute.xlu1 %169 }
 0x201   :  { %v172_v36 = vmul.f32 %v170_v35, %v148_v28 }
 0x203   :  { %174 = vrot.lane.b32.xlu2 %v172_v36, %s918_s17 }
 0x25d   :  { %v175_v37 = vpop.permute.xlu2 %174 }
 0x25e   :  { %178 = vst.msk [vmem:[#allocation8] sm:$0x1] %vm177_vm6, %v175_v37  ;;  %722 = vmatmul.msk.f32.vlgmr.msra.gmra.mxu2 %vm106_vm1, %v175_v37 }
 0x2e1   :  { %v198_v38 = vpop.f32.mrf.mxu2 }
 0x2e2   :  { %v202_v39 = vrot.slane %v198_v38, 7 }
 0x2e4   :  { %v204_v40 = vadd.f32 %v202_v39, %v971_v10 }
 0x2e6   :  { %754 = vtanh.f32 %v204_v40  ;;  %v723_v42 = vmul.f32 -1.442695, %v204_v40 }
 0x2e8   :  { %756 = vpow2.f32 %v723_v42 }
 0x2ec   :  { %v755_v41 = vpop.eup %754 }
 0x2ed   :  { %230 = vrot.lane.b32.xlu2 %v755_v41, %s917_s14 }
 0x2ee   :  { %v757_v43 = vpop.eup %756 }
 0x2ef   :  { %v208_v44 = vadd.f32 1.0, %v757_v43 }
 0x2f1   :  { %758 = vrcp.f32 %v208_v44  ;;  %v220_v50 = vand.u32 2147483648, %v208_v44  ;;  %vm214_vm8 = vweird.f32 %v208_v44  ;;  %v218_v51 = vand.u32 2147483647, %v208_v44 }
 0x2f3   :  { %v221_v53 = vor.u32 1.1754944e-38, %v220_v50  ;;  %vm219_vm10 = vcmp.eq.f32.partialorder %v218_v51, 8.507059e+37 }
 0x2f7   :  { %v759_v45 = vpop.eup %758 }
 0x2f8   :  { %v210_v46 = vmul.f32 %v759_v45, %v208_v44  ;;  %vm215_vm7 = vweird.f32 %v759_v45 }
 0x2f9   :  { %vm216_vm9 = vmor %vm214_vm8, %vm215_vm7 }
 0x2fa   :  { %v211_v47 = vsub.f32 1.0, %v210_v46 }
 0x2fc   :  { %v212_v48 = vmul.f32 %v759_v45, %v211_v47 }
 0x2fe   :  { %v213_v49 = vadd.f32 %v759_v45, %v212_v48 }
 0x300   :  { %v217_v52 = vsel %vm216_vm9, %v759_v45, %v213_v49 }
 0x301   :  { %v222_v55 = vsel %vm219_vm10, %v221_v53, %v217_v52 }
 0x302   :  { %v228_v58 = vmul.f32 %v226_v57, %v222_v55 }
 0x347   :  { %v231_v54 = vpop.permute.xlu2 %230 }
 0x348   :  { %v233_v56 = vmul.f32 %v231_v54, %v222_v55 }
 0x34a   :  { %235 = vrot.lane.b32.xlu0 %v233_v56, %s918_s17 }
 0x3bc   :  { %v236_v59 = vpop.permute.xlu0 %235 }
 0x3bd   :  { %v238_v60 = vadd.f32 %v236_v59, %v228_v58 }
 0x3bf   :  { %760 = vtanh.f32 %v238_v60  ;;  %v301_v22 = vrot.slane %v238_v60, 7 }
 0x3c5   :  { %v761_v61 = vpop.eup %760 }
 0x3c6   :  { %241 = vrot.lane.b32.xlu1 %v761_v61, %s917_s14 }
 0x438   :  { %v242_v62 = vpop.permute.xlu1 %241 }
 0x439   :  { %v987_v63 = vmul.f32 %v242_v62, %v222_v55 }
 0x43b   :  { %v251_v0 = vrot.slane %v987_v63, 1 }
 0x43d   :  { %252 = vrot.lane.b32.xlu2 %v251_v0, %s918_s17 }
 0x497   :  { %v253_v1 = vpop.permute.xlu2 %252 }
 0x498   :  { %724 = vmatmul.msk.f32.vlgmr.msra.gmra.mxu3 %vm106_vm1, %v253_v1 }
 0x51b   :  { %v273_v2 = vpop.f32.mrf.mxu3 }
 0x51c   :  { %v277_v3 = vrot.slane %v273_v2, 6 }
 0x51e   :  { %v279_v4 = vadd.f32 %v277_v3, %v971_v10 }
 0x520   :  { %762 = vtanh.f32 %v279_v4  ;;  %v725_v6 = vmul.f32 -1.442695, %v279_v4 }
 0x522   :  { %764 = vpow2.f32 %v725_v6 }
 0x526   :  { %v763_v5 = vpop.eup %762 }
 0x527   :  { %305 = vrot.lane.b32.xlu0 %v763_v5, %s917_s14 }
 0x528   :  { %v765_v7 = vpop.eup %764 }
 0x529   :  { %v283_v8 = vadd.f32 1.0, %v765_v7 }
 0x52b   :  { %766 = vrcp.f32 %v283_v8  ;;  %v295_v15 = vand.u32 2147483648, %v283_v8  ;;  %vm289_vm12 = vweird.f32 %v283_v8  ;;  %v293_v16 = vand.u32 2147483647, %v283_v8 }
 0x52d   :  { %v296_v18 = vor.u32 1.1754944e-38, %v295_v15  ;;  %vm294_vm14 = vcmp.eq.f32.partialorder %v293_v16, 8.507059e+37 }
 0x531   :  { %v767_v9 = vpop.eup %766 }
 0x532   :  { %v285_v11 = vmul.f32 %v767_v9, %v283_v8  ;;  %vm290_vm11 = vweird.f32 %v767_v9 }
 0x533   :  { %vm291_vm13 = vmor %vm289_vm12, %vm290_vm11 }
 0x534   :  { %v286_v12 = vsub.f32 1.0, %v285_v11 }
 0x536   :  { %v287_v13 = vmul.f32 %v767_v9, %v286_v12 }
 0x538   :  { %v288_v14 = vadd.f32 %v767_v9, %v287_v13 }
 0x53a   :  { %v292_v17 = vsel %vm291_vm13, %v767_v9, %v288_v14 }
 0x53b   :  { %v297_v20 = vsel %vm294_vm14, %v296_v18, %v292_v17 }
 0x53c   :  { %v303_v23 = vmul.f32 %v301_v22, %v297_v20 }
 0x599   :  { %v306_v19 = vpop.permute.xlu0 %305 }
 0x59a   :  { %v308_v21 = vmul.f32 %v306_v19, %v297_v20 }
 0x59c   :  { %310 = vrot.lane.b32.xlu1 %v308_v21, %s918_s17 }
 0x60e   :  { %v311_v24 = vpop.permute.xlu1 %310 }
 0x60f   :  { %v313_v25 = vadd.f32 %v311_v24, %v303_v23 }
 0x611   :  { %768 = vtanh.f32 %v313_v25  ;;  %v376_v50 = vrot.slane %v313_v25, 7 }
 0x617   :  { %v769_v26 = vpop.eup %768 }
 0x618   :  { %316 = vrot.lane.b32.xlu2 %v769_v26, %s917_s14 }
 0x672   :  { %v317_v27 = vpop.permute.xlu2 %316 }
 0x673   :  { %v996_v28 = vmul.f32 %v317_v27, %v297_v20 }
 0x675   :  { %v326_v29 = vrot.slane %v996_v28, 2 }
 0x677   :  { %327 = vrot.lane.b32.xlu0 %v326_v29, %s918_s17 }
 0x6e9   :  { %v328_v30 = vpop.permute.xlu0 %327 }
 0x6ea   :  { %726 = vmatmul.msk.f32.vlgmr.msrb.gmra.mxu0 %vm106_vm1, %v328_v30 }
 0x767   :  { %v348_v31 = vpop.f32.mrf.mxu0 }
 0x768   :  { %v352_v32 = vrot.slane %v348_v31, 5 }
 0x76a   :  { %v354_v33 = vadd.f32 %v352_v32, %v971_v10 }
 0x76c   :  { %770 = vtanh.f32 %v354_v33  ;;  %v727_v35 = vmul.f32 -1.442695, %v354_v33 }
 0x76e   :  { %772 = vpow2.f32 %v727_v35 }
 0x772   :  { %v771_v34 = vpop.eup %770 }
 0x773   :  { %380 = vrot.lane.b32.xlu1 %v771_v34, %s917_s14 }
 0x774   :  { %v773_v36 = vpop.eup %772 }
 0x775   :  { %v358_v37 = vadd.f32 1.0, %v773_v36 }
 0x777   :  { %774 = vrcp.f32 %v358_v37  ;;  %v370_v43 = vand.u32 2147483648, %v358_v37  ;;  %vm364_vm0 = vweird.f32 %v358_v37  ;;  %v368_v44 = vand.u32 2147483647, %v358_v37 }
 0x779   :  { %v371_v46 = vor.u32 1.1754944e-38, %v370_v43  ;;  %vm369_vm3 = vcmp.eq.f32.partialorder %v368_v44, 8.507059e+37 }
 0x77d   :  { %v775_v38 = vpop.eup %774 }
 0x77e   :  { %v360_v39 = vmul.f32 %v775_v38, %v358_v37  ;;  %vm365_vm15 = vweird.f32 %v775_v38 }
 0x77f   :  { %vm366_vm2 = vmor %vm364_vm0, %vm365_vm15 }
 0x780   :  { %v361_v40 = vsub.f32 1.0, %v360_v39 }
 0x782   :  { %v362_v41 = vmul.f32 %v775_v38, %v361_v40 }
 0x784   :  { %v363_v42 = vadd.f32 %v775_v38, %v362_v41 }
 0x786   :  { %v367_v45 = vsel %vm366_vm2, %v775_v38, %v363_v42 }
 0x787   :  { %v372_v48 = vsel %vm369_vm3, %v371_v46, %v367_v45 }
 0x788   :  { %v378_v51 = vmul.f32 %v376_v50, %v372_v48 }
 0x7e5   :  { %v381_v47 = vpop.permute.xlu1 %380 }
 0x7e6   :  { %v383_v49 = vmul.f32 %v381_v47, %v372_v48 }
 0x7e8   :  { %385 = vrot.lane.b32.xlu2 %v383_v49, %s918_s17 }
 0x842   :  { %v386_v52 = vpop.permute.xlu2 %385 }
 0x843   :  { %v388_v53 = vadd.f32 %v386_v52, %v378_v51 }
 0x845   :  { %776 = vtanh.f32 %v388_v53  ;;  %v451_v16 = vrot.slane %v388_v53, 7 }
 0x84b   :  { %v777_v54 = vpop.eup %776 }
 0x84c   :  { %391 = vrot.lane.b32.xlu0 %v777_v54, %s917_s14 }
 0x8be   :  { %v392_v55 = vpop.permute.xlu0 %391 }
 0x8bf   :  { %v1005_v56 = vmul.f32 %v392_v55, %v372_v48 }
 0x8c1   :  { %v401_v57 = vrot.slane %v1005_v56, 3 }
 0x8c3   :  { %402 = vrot.lane.b32.xlu1 %v401_v57, %s918_s17 }
 0x935   :  { %v403_v58 = vpop.permute.xlu1 %402 }
 0x936   :  { %728 = vmatmul.msk.f32.vlgmr.msrb.gmra.mxu1 %vm106_vm1, %v403_v58 }
 0x9b3   :  { %v423_v59 = vpop.f32.mrf.mxu1 }
 0x9b4   :  { %v427_v60 = vrot.slane %v423_v59, 4 }
 0x9b6   :  { %v429_v61 = vadd.f32 %v427_v60, %v971_v10 }
 0x9b8   :  { %778 = vtanh.f32 %v429_v61  ;;  %v729_v0 = vmul.f32 -1.442695, %v429_v61 }
 0x9ba   :  { %780 = vpow2.f32 %v729_v0 }
 0x9be   :  { %v779_v62 = vpop.eup %778 }
 0x9bf   :  { %455 = vrot.lane.b32.xlu2 %v779_v62, %s917_s14 }
 0x9c0   :  { %v781_v1 = vpop.eup %780 }
 0x9c1   :  { %v433_v2 = vadd.f32 1.0, %v781_v1 }
 0x9c3   :  { %782 = vrcp.f32 %v433_v2  ;;  %v445_v8 = vand.u32 2147483648, %v433_v2  ;;  %vm439_vm5 = vweird.f32 %v433_v2  ;;  %v443_v9 = vand.u32 2147483647, %v433_v2 }
 0x9c5   :  { %v446_v12 = vor.u32 1.1754944e-38, %v445_v8  ;;  %vm444_vm7 = vcmp.eq.f32.partialorder %v443_v9, 8.507059e+37 }
 0x9c9   :  { %v783_v3 = vpop.eup %782 }
 0x9ca   :  { %v435_v4 = vmul.f32 %v783_v3, %v433_v2  ;;  %vm440_vm4 = vweird.f32 %v783_v3 }
 0x9cb   :  { %vm441_vm6 = vmor %vm439_vm5, %vm440_vm4  ;;  %vm249_vm4 = vcmask 254977   ;;  %vm474_vm5 = vcmask 258052  }
 0x9cc   :  { %v436_v5 = vsub.f32 1.0, %v435_v4 }
 0x9ce   :  { %v437_v6 = vmul.f32 %v783_v3, %v436_v5 }
 0x9d0   :  { %v438_v7 = vadd.f32 %v783_v3, %v437_v6 }
 0x9d2   :  { %v442_v11 = vsel %vm441_vm6, %v783_v3, %v438_v7  ;;  %vm324_vm6 = vcmask 256002  }
 0x9d3   :  { %v447_v14 = vsel %vm444_vm7, %v446_v12, %v442_v11  ;;  %vm549_vm7 = vcmask 259077  }
 0x9d4   :  { %v453_v17 = vmul.f32 %v451_v16, %v447_v14 }
 0xa19   :  { %v456_v13 = vpop.permute.xlu2 %455 }
 0xa1a   :  { %v458_v15 = vmul.f32 %v456_v13, %v447_v14 }
 0xa1c   :  { %460 = vrot.lane.b32.xlu0 %v458_v15, %s918_s17 }
 0xa8e   :  { %v461_v18 = vpop.permute.xlu0 %460 }
 0xa8f   :  { %v463_v19 = vadd.f32 %v461_v18, %v453_v17 }
 0xa91   :  { %784 = vtanh.f32 %v463_v19  ;;  %v526_v45 = vrot.slane %v463_v19, 7 }
 0xa97   :  { %v785_v20 = vpop.eup %784 }
 0xa98   :  { %466 = vrot.lane.b32.xlu1 %v785_v20, %s917_s14 }
 0xb0a   :  { %v467_v21 = vpop.permute.xlu1 %466 }
 0xb0b   :  { %v1014_v22 = vmul.f32 %v467_v21, %v447_v14 }
 0xb0d   :  { %v476_v23 = vrot.slane %v1014_v22, 4 }
 0xb0f   :  { %477 = vrot.lane.b32.xlu2 %v476_v23, %s918_s17 }
 0xb69   :  { %v478_v24 = vpop.permute.xlu2 %477 }
 0xb6a   :  { %730 = vmatmul.msk.f32.vlgmr.msrb.gmra.mxu2 %vm106_vm1, %v478_v24 }
 0xbed   :  { %v498_v25 = vpop.f32.mrf.mxu2 }
 0xbee   :  { %v502_v26 = vrot.slane %v498_v25, 3 }
 0xbf0   :  { %v504_v27 = vadd.f32 %v502_v26, %v971_v10 }
 0xbf2   :  { %786 = vtanh.f32 %v504_v27  ;;  %v731_v30 = vmul.f32 -1.442695, %v504_v27 }
 0xbf4   :  { %788 = vpow2.f32 %v731_v30 }
 0xbf8   :  { %v787_v29 = vpop.eup %786 }
 0xbf9   :  { %530 = vrot.lane.b32.xlu0 %v787_v29, %s917_s14 }
 0xbfa   :  { %v789_v31 = vpop.eup %788 }
 0xbfb   :  { %v508_v32 = vadd.f32 1.0, %v789_v31 }
 0xbfd   :  { %790 = vrcp.f32 %v508_v32  ;;  %v520_v38 = vand.u32 2147483648, %v508_v32  ;;  %vm514_vm9 = vweird.f32 %v508_v32  ;;  %v518_v39 = vand.u32 2147483647, %v508_v32 }
 0xbff   :  { %v521_v41 = vor.u32 1.1754944e-38, %v520_v38  ;;  %vm519_vm11 = vcmp.eq.f32.partialorder %v518_v39, 8.507059e+37 }
 0xc03   :  { %v791_v33 = vpop.eup %790 }
 0xc04   :  { %v510_v34 = vmul.f32 %v791_v33, %v508_v32  ;;  %vm515_vm8 = vweird.f32 %v791_v33 }
 0xc05   :  { %vm516_vm10 = vmor %vm514_vm9, %vm515_vm8  ;;  %vm399_vm8 = vcmask 257027   ;;  %vm624_vm9 = vcmask 260102  }
 0xc06   :  { %v511_v35 = vsub.f32 1.0, %v510_v34 }
 0xc08   :  { %v512_v36 = vmul.f32 %v791_v33, %v511_v35 }
 0xc0a   :  { %v513_v37 = vadd.f32 %v791_v33, %v512_v36 }
 0xc0c   :  { %v517_v40 = vsel %vm516_vm10, %v791_v33, %v513_v37  ;;  %vm699_vm10 = vcmask 261127  }
 0xc0d   :  { %v522_v43 = vsel %vm519_vm11, %v521_v41, %v517_v40 }
 0xc0e   :  { %v528_v46 = vmul.f32 %v526_v45, %v522_v43 }
 0xc6b   :  { %v531_v42 = vpop.permute.xlu0 %530 }
 0xc6c   :  { %v533_v44 = vmul.f32 %v531_v42, %v522_v43 }
 0xc6e   :  { %535 = vrot.lane.b32.xlu1 %v533_v44, %s918_s17 }
 0xce0   :  { %v536_v47 = vpop.permute.xlu1 %535 }
 0xce1   :  { %v538_v48 = vadd.f32 %v536_v47, %v528_v46 }
 0xce3   :  { %792 = vtanh.f32 %v538_v48  ;;  %v601_v12 = vrot.slane %v538_v48, 7 }
 0xce9   :  { %v793_v49 = vpop.eup %792 }
 0xcea   :  { %541 = vrot.lane.b32.xlu2 %v793_v49, %s917_s14 }
 0xd44   :  { %v542_v50 = vpop.permute.xlu2 %541 }
 0xd45   :  { %v1023_v51 = vmul.f32 %v542_v50, %v522_v43 }
 0xd47   :  { %v551_v52 = vrot.slane %v1023_v51, 5 }
 0xd49   :  { %552 = vrot.lane.b32.xlu0 %v551_v52, %s918_s17 }
 0xdbb   :  { %v553_v53 = vpop.permute.xlu0 %552 }
 0xdbc   :  { %732 = vmatmul.msk.f32.vlgmr.msrb.gmra.mxu3 %vm106_vm1, %v553_v53 }
 0xe3f   :  { %v573_v54 = vpop.f32.mrf.mxu3 }
 0xe40   :  { %v577_v55 = vrot.slane %v573_v54, 2 }
 0xe42   :  { %v579_v57 = vadd.f32 %v577_v55, %v971_v10 }
 0xe44   :  { %794 = vtanh.f32 %v579_v57  ;;  %v733_v59 = vmul.f32 -1.442695, %v579_v57 }
 0xe46   :  { %796 = vpow2.f32 %v733_v59 }
 0xe4a   :  { %v795_v58 = vpop.eup %794 }
 0xe4b   :  { %605 = vrot.lane.b32.xlu1 %v795_v58, %s917_s14 }
 0xe4c   :  { %v797_v60 = vpop.eup %796 }
 0xe4d   :  { %v583_v61 = vadd.f32 1.0, %v797_v60 }
 0xe4f   :  { %798 = vrcp.f32 %v583_v61  ;;  %v595_v4 = vand.u32 2147483648, %v583_v61  ;;  %vm589_vm13 = vweird.f32 %v583_v61  ;;  %v593_v5 = vand.u32 2147483647, %v583_v61 }
 0xe51   :  { %v596_v7 = vor.u32 1.1754944e-38, %v595_v4  ;;  %vm594_vm15 = vcmp.eq.f32.partialorder %v593_v5, 8.507059e+37 }
 0xe55   :  { %v799_v62 = vpop.eup %798 }
 0xe56   :  { %v585_v0 = vmul.f32 %v799_v62, %v583_v61  ;;  %vm590_vm12 = vweird.f32 %v799_v62 }
 0xe57   :  { %vm591_vm14 = vmor %vm589_vm13, %vm590_vm12 }
 0xe58   :  { %v586_v1 = vsub.f32 1.0, %v585_v0 }
 0xe5a   :  { %v587_v2 = vmul.f32 %v799_v62, %v586_v1 }
 0xe5c   :  { %v588_v3 = vadd.f32 %v799_v62, %v587_v2 }
 0xe5e   :  { %v592_v6 = vsel %vm591_vm14, %v799_v62, %v588_v3 }
 0xe5f   :  { %v597_v9 = vsel %vm594_vm15, %v596_v7, %v592_v6 }
 0xe60   :  { %v603_v13 = vmul.f32 %v601_v12, %v597_v9 }
 0xebd   :  { %v606_v8 = vpop.permute.xlu1 %605 }
 0xebe   :  { %v608_v11 = vmul.f32 %v606_v8, %v597_v9 }
 0xec0   :  { %610 = vrot.lane.b32.xlu2 %v608_v11, %s918_s17 }
 0xf1a   :  { %v611_v14 = vpop.permute.xlu2 %610 }
 0xf1b   :  { %v613_v15 = vadd.f32 %v611_v14, %v603_v13 }
 0xf1d   :  { %800 = vtanh.f32 %v613_v15  ;;  %v676_v41 = vrot.slane %v613_v15, 7 }
 0xf23   :  { %v801_v16 = vpop.eup %800 }
 0xf24   :  { %616 = vrot.lane.b32.xlu0 %v801_v16, %s917_s14 }
 0xf96   :  { %v617_v17 = vpop.permute.xlu0 %616 }
 0xf97   :  { %v619_v18 = vmul.f32 %v617_v17, %v597_v9 }
 0xf99   :  { %v626_v19 = vrot.slane %v619_v18, 6 }
 0xf9b   :  { %627 = vrot.lane.b32.xlu1 %v626_v19, %s918_s17 }
0x100d   :  { %v628_v20 = vpop.permute.xlu1 %627 }
0x100e   :  { %734 = vmatmul.msk.f32.vlgmr.msra.gmra.mxu0 %vm106_vm1, %v628_v20 }
0x108b   :  { %v648_v21 = vpop.f32.mrf.mxu0 }
0x108c   :  { %v652_v23 = vrot.slane %v648_v21, 1 }
0x108e   :  { %v654_v24 = vadd.f32 %v652_v23, %v971_v10 }
0x1090   :  { %802 = vtanh.f32 %v654_v24  ;;  %v735_v26 = vmul.f32 -1.442695, %v654_v24 }
0x1092   :  { %804 = vpow2.f32 %v735_v26 }
0x1096   :  { %v803_v25 = vpop.eup %802 }
0x1097   :  { %680 = vrot.lane.b32.xlu2 %v803_v25, %s917_s14 }
0x1098   :  { %v805_v27 = vpop.eup %804 }
0x1099   :  { %v658_v29 = vadd.f32 1.0, %v805_v27 }
0x109b   :  { %806 = vrcp.f32 %v658_v29  ;;  %v670_v34 = vand.u32 2147483648, %v658_v29  ;;  %vm664_vm0 = vweird.f32 %v658_v29  ;;  %v668_v35 = vand.u32 2147483647, %v658_v29 }
0x109d   :  { %vm669_vm3 = vcmp.eq.f32.partialorder %v668_v35, 8.507059e+37 }
0x109f   :  { %246 = vrot.lane.b32.xlu2 %v987_v63, %s918_s17  ;;  %v671_v63 = vor.u32 1.1754944e-38, %v670_v34 }
0x10a1   :  { %v807_v30 = vpop.eup %806 }
0x10a2   :  { %v660_v31 = vmul.f32 %v807_v30, %v658_v29  ;;  %vm665_vm1 = vweird.f32 %v807_v30 }
0x10a3   :  { %vm666_vm2 = vmor %vm664_vm0, %vm665_vm1 }
0x10a4   :  { %v661_v32 = vsub.f32 1.0, %v660_v31 }
0x10a6   :  { %v662_v33 = vmul.f32 %v807_v30, %v661_v32 }
0x10a7   :  { %471 = vrot.lane.b32.xlu2 %v1014_v22, %s918_s17 }
0x10a8   :  { %v663_v10 = vadd.f32 %v807_v30, %v662_v33 }
0x10aa   :  { %v667_v36 = vsel %vm666_vm2, %v807_v30, %v663_v10 }
0x10ab   :  { %v672_v22 = vsel %vm669_vm3, %v671_v63, %v667_v36 }
0x10ac   :  { %v678_v42 = vmul.f32 %v676_v41, %v672_v22 }
0x10f1   :  { %v681_v37 = vpop.permute.xlu2 %680 }
0x10f2   :  { %v683_v38 = vmul.f32 %v681_v37, %v672_v22 }
0x10f4   :  { %685 = vrot.lane.b32.xlu0 %v683_v38, %s918_s17 }
0x10f9   :  { %v247_v39 = vpop.permute.xlu2 %246 }
0x10fa   :  { %250 = vst.msk [vmem:[#allocation8] sm:$0x2] %vm249_vm4, %v247_v39 }
0x10fc   :  { %321 = vrot.lane.b32.xlu0 %v996_v28, %s918_s17 }
0x1101   :  { %v472_v40 = vpop.permute.xlu2 %471 }
0x1102   :  { %475 = vst.msk [vmem:[#allocation8] sm:$0x10] %vm474_vm5, %v472_v40 }
0x1104   :  { %546 = vrot.lane.b32.xlu0 %v1023_v51, %s918_s17 }
0x1166   :  { %v686_v43 = vpop.permute.xlu0 %685 }
0x1167   :  { %v688_v44 = vadd.f32 %v686_v43, %v678_v42 }
0x1169   :  { %808 = vtanh.f32 %v688_v44 }
0x116e   :  { %v322_v45 = vpop.permute.xlu0 %321 }
0x116f   :  { %v809_v46 = vpop.eup %808  ;;  %325 = vst.msk [vmem:[#allocation8] sm:$0x4] %vm324_vm6, %v322_v45 }
0x1170   :  { %691 = vrot.lane.b32.xlu1 %v809_v46, %s917_s14 }
0x1176   :  { %v547_v47 = vpop.permute.xlu0 %546 }
0x1177   :  { %550 = vst.msk [vmem:[#allocation8] sm:$0x20] %vm549_vm7, %v547_v47 }
0x1178   :  { %396 = vrot.lane.b32.xlu1 %v1005_v56, %s918_s17 }
0x1180   :  { %621 = vrot.lane.b32.xlu1 %v619_v18, %s918_s17 }
0x11e2   :  { %v692_v28 = vpop.permute.xlu1 %691 }
0x11e3   :  { %v694_v48 = vmul.f32 %v692_v28, %v672_v22 }
0x11e5   :  { %696 = vrot.lane.b32.xlu2 %v694_v48, %s918_s17 }
0x11ea   :  { %v397_v49 = vpop.permute.xlu1 %396 }
0x11eb   :  { %400 = vst.msk [vmem:[#allocation8] sm:$0x8] %vm399_vm8, %v397_v49 }
0x11f2   :  { %v622_v50 = vpop.permute.xlu1 %621 }
0x11f3   :  { %625 = vst.msk [vmem:[#allocation8] sm:$0x40] %vm624_vm9, %v622_v50 }
0x123f   :  { %v697_v56 = vpop.permute.xlu2 %696 }
0x1240   :  { %700 = vst.msk [vmem:[#allocation8] sm:$0x80] %vm699_vm10, %v697_v56 }
0x1241   :  { %711 = dma.vmem_to_hbm [thread:$0]  %s707_s5, 128, %s709_s20, [#allocation4]  }
0x1242   :  { %910 = dma.done.wait [#allocation4], 128  }
0x1243   :  { %911 = vsyncadd [#allocation4], 4294967168 }
0x1244   :  { %716 = vsyncpa [#allocation3], 1 }
0x1245   :  { %717 = vsyncpa [#allocation6], 1 }
0x1246   :  { %718 = vsyncpa [#allocation4], 1 }

</bundles_post_ra>
